<compile_context>
chip_gen: v7x
topology: tpu7x:2x2x1
jax: 0.10.0
libtpu: 0.0.40
codegen_flags: <defaults>
</compile_context>

<pallas_src>
import functools

import jax
import jax.numpy as jnp
from jax.experimental import pallas as pl
from jax.experimental.pallas import tpu as pltpu


def _fcos_level_kernel(img_ref,          # scalar-prefetch SMEM: (N, 2) int32 [h, w]
                       loc_ref,          # (4, T)       f32 rows = [xs, ys, xs, ys]
                       cls_ref,          # (1, C, T)    raw logits (native dtype)
                       reg_ref,          # (1, 4, T)
                       ctr_ref,          # (1, 1, T)    raw logits
                       scores_ref,       # (1, C, T)    f32  sqrt(sig(cls)*sig(ctr))
                       det_ref,          # (1, 4, T)    f32  clipped xyxy boxes
                       cand_ref,         # (1, C, T)    int8 candidate mask
                       keep_ref,         # (1, 1, T)    int8 min-size keep mask
                       cnt_ref,          # (1, 1, 1, 128) int32 per-tile candidate count
                       *,
                       pre_nms_thresh, min_size, hw):
    i = pl.program_id(0)          # image index
    t = pl.program_id(1)          # spatial tile index

    # --- classification / centerness ----------------------------------------
    sig_cls = jax.nn.sigmoid(cls_ref[0].astype(jnp.float32))          # (C, T)
    sig_ctr = jax.nn.sigmoid(ctr_ref[0].astype(jnp.float32))          # (1, T)

    cand = sig_cls > pre_nms_thresh                                   # (C, T) bool
    cand_ref[0] = cand.astype(cand_ref.dtype)

    # per-tile candidate count; mask the padded tail of a boundary tile
    C, T = sig_cls.shape
    valid = jnp.minimum(jnp.int32(hw) - t * jnp.int32(T), jnp.int32(T))
    lane = jax.lax.broadcasted_iota(jnp.int32, (C, T), 1)
    cnt = jnp.sum(jnp.where(jnp.logical_and(cand, lane < valid),
                            jnp.int32(1), jnp.int32(0)))
    cnt_ref[...] = jnp.full(cnt_ref.shape, cnt, dtype=cnt_ref.dtype)

    # scores = sqrt(box_cls * centerness)  (dense; torch only gathers afterwards)
    scores_ref[0] = jnp.sqrt(sig_cls * sig_ctr).astype(scores_ref.dtype)

    # --- box decode: det = loc4 + sign * reg, clipped to image ---------------
    reg = reg_ref[0].astype(jnp.float32)                              # (4, T)
    loc4 = loc_ref[...].astype(jnp.float32)                           # (4, T)
    row = jax.lax.broadcasted_iota(jnp.int32, (4, 1), 0)              # 0..3
    sign = jnp.where(row < 2, -1.0, 1.0)                              # (4, 1)
    h_img = img_ref[i, 0].astype(jnp.float32)
    w_img = img_ref[i, 1].astype(jnp.float32)
    # clip_to_image (BoxList TO_REMOVE = 1): x in [0, w-1], y in [0, h-1]
    hi = jnp.where((row % 2) == 0, w_img - 1.0, h_img - 1.0)          # (4, 1)
    det = jnp.clip(loc4 + sign * reg, 0.0, hi)                        # (4, T)
    det_ref[0] = det.astype(det_ref.dtype)

    # remove_small_boxes: widths/heights in xywh mode (TO_REMOVE = 1)
    wh = det[2:4, :] - det[0:2, :] + 1.0                              # (2, T)
    keep = jnp.logical_and(wh[0:1, :] >= float(min_size),
                           wh[1:2, :] >= float(min_size))             # (1, T)
    keep_ref[0] = keep.astype(keep_ref.dtype)


def fcos_postprocess_level(locations, box_cls, box_regression, centerness,
                           image_sizes, *, pre_nms_thresh, pre_nms_top_n,
                           min_size, tile_hw=2048):
    """One FPN level.  locations: (HW, 2); box_cls: (N, C, H, W);
    box_regression: (N, 4, H, W); centerness: (N, 1, H, W);
    image_sizes: (N, 2) int32 as [h, w]."""
    N, C, H, W = box_cls.shape
    HW = H * W

    # Only free reshapes here: no dtype upcast / pad / concat passes over HBM.
    cls = box_cls.reshape(N, C, HW)
    reg = box_regression.reshape(N, 4, HW)
    ctr = centerness.reshape(N, 1, HW)
    xs = locations[:, 0].astype(jnp.float32)
    ys = locations[:, 1].astype(jnp.float32)
    loc4 = jnp.stack([xs, ys, xs, ys], axis=0)                        # (4, HW) tiny
    img = image_sizes.astype(jnp.int32)                               # (N, 2)

    tile_hw = max(128, (int(tile_hw) // 128) * 128)                   # lane multiple
    tile = HW if HW <= tile_hw else tile_hw
    n_tiles = pl.cdiv(HW, tile)

    kernel = functools.partial(
        _fcos_level_kernel,
        pre_nms_thresh=float(pre_nms_thresh),
        min_size=int(min_size),
        hw=int(HW),
    )

    grid_spec = pltpu.PrefetchScalarGridSpec(
        num_scalar_prefetch=1,          # image_sizes -> SMEM
        grid=(N, n_tiles),
        in_specs=[
            pl.BlockSpec((4, tile), lambda i, t, img: (0, t)),
            pl.BlockSpec((1, C, tile), lambda i, t, img: (i, 0, t)),
            pl.BlockSpec((1, 4, tile), lambda i, t, img: (i, 0, t)),
            pl.BlockSpec((1, 1, tile), lambda i, t, img: (i, 0, t)),
        ],
        out_specs=[
            pl.BlockSpec((1, C, tile), lambda i, t, img: (i, 0, t)),
            pl.BlockSpec((1, 4, tile), lambda i, t, img: (i, 0, t)),
            pl.BlockSpec((1, C, tile), lambda i, t, img: (i, 0, t)),
            pl.BlockSpec((1, 1, tile), lambda i, t, img: (i, 0, t)),
            pl.BlockSpec((1, 1, 1, 128), lambda i, t, img: (i, t, 0, 0)),
        ],
    )

    out_shape = (
        jax.ShapeDtypeStruct((N, C, HW), jnp.float32),        # scores
        jax.ShapeDtypeStruct((N, 4, HW), jnp.float32),        # decoded clipped boxes
        jax.ShapeDtypeStruct((N, C, HW), jnp.int8),           # candidate mask
        jax.ShapeDtypeStruct((N, 1, HW), jnp.int8),           # min-size keep mask
        jax.ShapeDtypeStruct((N, n_tiles, 1, 128), jnp.int32) # per-tile cand counts
    )

    scores, dets, cand, keep, cnt = pl.pallas_call(
        kernel,
        grid_spec=grid_spec,
        out_shape=out_shape,
        compiler_params=pltpu.CompilerParams(
            dimension_semantics=("parallel", "parallel")),
    )(img, loc4, cls, reg, ctr)

    # clamp(sum over tiles, max=pre_nms_top_n) -- tiny wrapper-side reduction
    pre_nms_top_n_per_image = jnp.minimum(cnt[:, :, 0, 0].sum(axis=1),
                                          jnp.int32(pre_nms_top_n))
    return scores, dets, cand, keep[:, 0, :], pre_nms_top_n_per_image


def fcos_postprocessor_forward(locations_list, box_cls_list, box_reg_list,
                               centerness_list, image_sizes, *,
                               pre_nms_thresh, pre_nms_top_n, min_size,
                               tile_hw=2048):
    """Dense equivalent of FCOSPostProcessor.forward (is_rotated=False) up to
    (and including) box decode / clip / min-size filtering.  Returns per-level
    lists (scores, dets, cand, keep) plus per-image-per-level clamped counts;
    no concatenated slab is materialized (avoids an extra HBM pass)."""
    per_level = []
    for loc, cls, reg, ctr in zip(locations_list, box_cls_list,
                                  box_reg_list, centerness_list):
        per_level.append(
            fcos_postprocess_level(loc, cls, reg, ctr, image_sizes,
                                   pre_nms_thresh=pre_nms_thresh,
                                   pre_nms_top_n=pre_nms_top_n,
                                   min_size=min_size, tile_hw=tile_hw))

    scores = [p[0] for p in per_level]   # list of (N, C, HW_l) f32
    dets = [p[1] for p in per_level]     # list of (N, 4, HW_l) f32
    cand = [p[2] for p in per_level]     # list of (N, C, HW_l) int8
    keep = [p[3] for p in per_level]     # list of (N, HW_l)    int8
    topn = jnp.stack([p[4] for p in per_level], axis=-1)   # (N, n_levels)
    # TODO(synk): nonzero gather / per-image top-k / boxlist_ml_nms / kthvalue
    # and cat_boxlist over levels have dynamic output shapes (no clean Pallas
    # equivalent); the dense per-level outputs above fully determine them.
    return scores, dets, cand, keep, topn


# ----------------------------- pure-JAX reference ---------------------------
def _ref_level(loc, cls, reg, ctr, img, thresh, topn, min_size):
    N, C, H, W = cls.shape
    HW = H * W
    cls_s = jax.nn.sigmoid(cls.reshape(N, C, HW))
    ctr_s = jax.nn.sigmoid(ctr.reshape(N, 1, HW))
    cand = (cls_s > thresh).astype(jnp.int32)
    cnt = jnp.minimum(cand.reshape(N, -1).sum(1), topn)
    scores = jnp.sqrt(cls_s * ctr_s)
    r4 = reg.reshape(N, 4, HW)
    xs = loc[:, 0][None, :]
    ys = loc[:, 1][None, :]
    x1 = xs - r4[:, 0]
    y1 = ys - r4[:, 1]
    x2 = xs + r4[:, 2]
    y2 = ys + r4[:, 3]
    h_img = img[:, 0:1].astype(jnp.float32)
    w_img = img[:, 1:2].astype(jnp.float32)
    x1 = jnp.clip(x1, 0.0, w_img - 1.0)
    x2 = jnp.clip(x2, 0.0, w_img - 1.0)
    y1 = jnp.clip(y1, 0.0, h_img - 1.0)
    y2 = jnp.clip(y2, 0.0, h_img - 1.0)
    dets = jnp.stack([x1, y1, x2, y2], axis=1)
    keep = ((x2 - x1 + 1.0 >= min_size) & (y2 - y1 + 1.0 >= min_size)).astype(jnp.int32)
    return scores, dets, cand, keep, cnt


def _make_locations(H, W, stride):
    sx = (jnp.arange(W, dtype=jnp.float32) + 0.5) * stride
    sy = (jnp.arange(H, dtype=jnp.float32) + 0.5) * stride
    yy, xx = jnp.meshgrid(sy, sx, indexing="ij")
    return jnp.stack([xx.reshape(-1), yy.reshape(-1)], axis=1)   # (HW, 2)


if __name__ == "__main__":
    key = jax.random.PRNGKey(0)
    N, num_classes = 2, 5
    C = num_classes - 1
    # (H, W, stride): includes a multi-tile level, a non-128-multiple level and
    # a tiny level to exercise tiling + boundary masking at small shapes.
    level_shapes = [(16, 16, 8), (10, 20, 16), (8, 8, 32)]

    pre_nms_thresh = 0.3
    pre_nms_top_n = 50
    min_size = 0

    locations_list, cls_list, reg_list, ctr_list = [], [], [], []
    for (H, W, stride) in level_shapes:
        key, k1, k2, k3 = jax.random.split(key, 4)
        locations_list.append(_make_locations(H, W, stride))
        cls_list.append(jax.random.normal(k1, (N, C, H, W), jnp.float32))
        reg_list.append(jnp.abs(jax.random.normal(k2, (N, 4, H, W), jnp.float32)) * 8.0)
        ctr_list.append(jax.random.normal(k3, (N, 1, H, W), jnp.float32))

    image_sizes = jnp.array([[128, 160], [120, 150]], dtype=jnp.int32)  # (h, w)

    # small tile size so the test exercises multi-tile grids + boundary masking
    scores, dets, cand, keep, topn = fcos_postprocessor_forward(
        locations_list, cls_list, reg_list, ctr_list, image_sizes,
        pre_nms_thresh=pre_nms_thresh, pre_nms_top_n=pre_nms_top_n,
        min_size=min_size, tile_hw=128)
    jax.block_until_ready((scores, dets, cand, keep, topn))

    # reference check (per level)
    for lvl in range(len(level_shapes)):
        rs, rd, rc, rk, rn = _ref_level(locations_list[lvl], cls_list[lvl],
                                        reg_list[lvl], ctr_list[lvl],
                                        image_sizes, pre_nms_thresh,
                                        pre_nms_top_n, min_size)
        assert jnp.allclose(scores[lvl], rs, atol=1e-3, rtol=1e-3)
        assert jnp.allclose(dets[lvl], rd, atol=1e-3, rtol=1e-3)
        assert jnp.array_equal(cand[lvl].astype(jnp.int32), rc)
        assert jnp.array_equal(keep[lvl].astype(jnp.int32), rk)
        assert jnp.array_equal(topn[:, lvl], rn)

    print("KERNEL_OK")
</pallas_src>

<mosaic_0001>
module attributes {stable_mosaic.version = 11 : i64} {
  func.func @_fcos_level_kernel(%arg0: i32, %arg1: i32, %arg2: memref<2x2xi32, #tpu.memory_space<smem>>, %arg3: memref<4x128xf32, #tpu.memory_space<vmem>>, %arg4: memref<1x4x128xf32, #tpu.memory_space<vmem>>, %arg5: memref<1x4x128xf32, #tpu.memory_space<vmem>>, %arg6: memref<1x1x128xf32, #tpu.memory_space<vmem>>, %arg7: memref<1x4x128xf32, #tpu.memory_space<vmem>>, %arg8: memref<1x4x128xf32, #tpu.memory_space<vmem>>, %arg9: memref<1x4x128xi8, #tpu.memory_space<vmem>>, %arg10: memref<1x1x128xi8, #tpu.memory_space<vmem>>, %arg11: memref<1x1x1x128xi32, #tpu.memory_space<vmem>>) attributes {dimension_semantics = [#tpu.dimension_semantics<parallel>, #tpu.dimension_semantics<parallel>], iteration_bounds = array<i64: 2, 2>, scalar_prefetch = 1 : i64, scratch_operands = 0 : i64, tpu.core_type = #tpu.core_type<tc>, window_params = [{transform_indices = @transform_0, window_bounds = array<i64: 4, 128>}, {transform_indices = @transform_1, window_bounds = array<i64: 1, 4, 128>}, {transform_indices = @transform_2, window_bounds = array<i64: 1, 4, 128>}, {transform_indices = @transform_3, window_bounds = array<i64: 1, 1, 128>}, {transform_indices = @transform_4, window_bounds = array<i64: 1, 4, 128>}, {transform_indices = @transform_5, window_bounds = array<i64: 1, 4, 128>}, {transform_indices = @transform_6, window_bounds = array<i64: 1, 4, 128>}, {transform_indices = @transform_7, window_bounds = array<i64: 1, 1, 128>}, {transform_indices = @transform_8, window_bounds = array<i64: 1, 1, 1, 128>}]} {
    %c0 = arith.constant 0 : index
    %c0_0 = arith.constant 0 : index
    %c0_1 = arith.constant 0 : index
    %0 = vector.load %arg4[%c0, %c0_0, %c0_1] : memref<1x4x128xf32, #tpu.memory_space<vmem>>, vector<1x4x128xf32>
    %1 = vector.shape_cast %0 : vector<1x4x128xf32> to vector<4x128xf32>
    %2 = arith.negf %1 : vector<4x128xf32>
    %3 = math.exp %2 : vector<4x128xf32>
    %cst = arith.constant 1.000000e+00 : f32
    %4 = vector.broadcast %cst : f32 to vector<4x128xf32>
    %5 = arith.addf %4, %3 : vector<4x128xf32>
    %6 = arith.divf %4, %5 : vector<4x128xf32>
    %c0_2 = arith.constant 0 : index
    %c0_3 = arith.constant 0 : index
    %c0_4 = arith.constant 0 : index
    %7 = vector.load %arg6[%c0_2, %c0_3, %c0_4] : memref<1x1x128xf32, #tpu.memory_space<vmem>>, vector<1x1x128xf32>
    %8 = vector.shape_cast %7 : vector<1x1x128xf32> to vector<1x128xf32>
    %9 = arith.negf %8 : vector<1x128xf32>
    %10 = math.exp %9 : vector<1x128xf32>
    %cst_5 = arith.constant 1.000000e+00 : f32
    %11 = vector.broadcast %cst_5 : f32 to vector<1x128xf32>
    %12 = arith.addf %11, %10 : vector<1x128xf32>
    %13 = arith.divf %11, %12 : vector<1x128xf32>
    %cst_6 = arith.constant 3.000000e-01 : f32
    %14 = vector.broadcast %cst_6 : f32 to vector<4x128xf32>
    %15 = arith.cmpf ogt, %6, %14 : vector<4x128xf32>
    %16 = arith.extui %15 : vector<4x128xi1> to vector<4x128xi8>
    %c0_7 = arith.constant 0 : index
    %c0_8 = arith.constant 0 : index
    %c0_9 = arith.constant 0 : index
    %17 = vector.load %arg9[%c0_7, %c0_8, %c0_9] : memref<1x4x128xi8, #tpu.memory_space<vmem>>, vector<1x4x128xi8>
    %18 = vector.shape_cast %17 : vector<1x4x128xi8> to vector<4x128xi8>
    %19 = vector.shape_cast %16 : vector<4x128xi8> to vector<1x4x128xi8>
    tpu.vector_store %arg9[%c0_7, %c0_8, %c0_9], %19 {strides = array<i32>} : memref<1x4x128xi8, #tpu.memory_space<vmem>>, vector<1x4x128xi8>,
    %c128_i32 = arith.constant 128 : i32
    %20 = arith.muli %arg1, %c128_i32 : i32
    %c256_i32 = arith.constant 256 : i32
    %21 = arith.subi %c256_i32, %20 : i32
    %c128_i32_10 = arith.constant 128 : i32
    %22 = arith.minsi %21, %c128_i32_10 : i32
    %23 = tpu.iota {dimensions = array<i32: 1>} : vector<4x128xi32>
    %24 = vector.broadcast %22 : i32 to vector<4x128xi32>
    %25 = arith.cmpi slt, %23, %24 : vector<4x128xi32>
    %26 = arith.andi %15, %25 : vector<4x128xi1>
    %c1_i32 = arith.constant 1 : i32
    %c0_i32 = arith.constant 0 : i32
    %27 = vector.broadcast %c1_i32 : i32 to vector<4x128xi32>
    %28 = vector.broadcast %c0_i32 : i32 to vector<4x128xi32>
    %29 = arith.select %26, %27, %28 : vector<4x128xi1>, vector<4x128xi32>
    %30 = vector.shape_cast %29 : vector<4x128xi32> to vector<1x4x128xi32>
    %cst_11 = arith.constant dense<0> : vector<1xi32>
    %31 = vector.multi_reduction <add>, %30, %cst_11 [1, 2] : vector<1x4x128xi32> to vector<1xi32>
    %32 = vector.shape_cast %31 : vector<1xi32> to vector<1x1x1xi32>
    %33 = vector.extract %32[0, 0, 0] : i32 from vector<1x1x1xi32>
    %34 = vector.broadcast %33 : i32 to vector<1x1x1x128xi32>
    %c0_12 = arith.constant 0 : index
    %c0_13 = arith.constant 0 : index
    %c0_14 = arith.constant 0 : index
    %c0_15 = arith.constant 0 : index
    %35 = vector.load %arg11[%c0_12, %c0_13, %c0_14, %c0_15] : memref<1x1x1x128xi32, #tpu.memory_space<vmem>>, vector<1x1x1x128xi32>
    tpu.vector_store %arg11[%c0_12, %c0_13, %c0_14, %c0_15], %34 {strides = array<i32>} : memref<1x1x1x128xi32, #tpu.memory_space<vmem>>, vector<1x1x1x128xi32>,
    %36 = vector.broadcast %13 : vector<1x128xf32> to vector<4x128xf32>
    %37 = arith.mulf %6, %36 : vector<4x128xf32>
    %38 = math.sqrt %37 : vector<4x128xf32>
    %c0_16 = arith.constant 0 : index
    %c0_17 = arith.constant 0 : index
    %c0_18 = arith.constant 0 : index
    %39 = vector.load %arg7[%c0_16, %c0_17, %c0_18] : memref<1x4x128xf32, #tpu.memory_space<vmem>>, vector<1x4x128xf32>
    %40 = vector.shape_cast %39 : vector<1x4x128xf32> to vector<4x128xf32>
    %41 = vector.shape_cast %38 : vector<4x128xf32> to vector<1x4x128xf32>
    tpu.vector_store %arg7[%c0_16, %c0_17, %c0_18], %41 {strides = array<i32>} : memref<1x4x128xf32, #tpu.memory_space<vmem>>, vector<1x4x128xf32>,
    %c0_19 = arith.constant 0 : index
    %c0_20 = arith.constant 0 : index
    %c0_21 = arith.constant 0 : index
    %42 = vector.load %arg5[%c0_19, %c0_20, %c0_21] : memref<1x4x128xf32, #tpu.memory_space<vmem>>, vector<1x4x128xf32>
    %43 = vector.shape_cast %42 : vector<1x4x128xf32> to vector<4x128xf32>
    %c0_22 = arith.constant 0 : index
    %c0_23 = arith.constant 0 : index
    %44 = vector.load %arg3[%c0_22, %c0_23] : memref<4x128xf32, #tpu.memory_space<vmem>>, vector<4x128xf32>
    %45 = tpu.iota {dimensions = array<i32: 0>} : vector<4x1xi32>
    %c2_i32 = arith.constant 2 : i32
    %46 = vector.broadcast %c2_i32 : i32 to vector<4x1xi32>
    %47 = arith.cmpi slt, %45, %46 : vector<4x1xi32>
    %cst_24 = arith.constant -1.000000e+00 : f32
    %cst_25 = arith.constant 1.000000e+00 : f32
    %48 = vector.broadcast %cst_24 : f32 to vector<4x1xf32>
    %49 = vector.broadcast %cst_25 : f32 to vector<4x1xf32>
    %50 = arith.select %47, %48, %49 : vector<4x1xi1>, vector<4x1xf32>
    %51 = arith.index_cast %arg0 : i32 to index
    %c0_26 = arith.constant 0 : index
    %52 = memref.load %arg2[%51, %c0_26] : memref<2x2xi32, #tpu.memory_space<smem>>
    %53 = arith.sitofp %52 : i32 to f32
    %54 = arith.index_cast %arg0 : i32 to index
    %c1 = arith.constant 1 : index
    %55 = memref.load %arg2[%54, %c1] : memref<2x2xi32, #tpu.memory_space<smem>>
    %56 = arith.sitofp %55 : i32 to f32
    %c2_i32_27 = arith.constant 2 : i32
    %c0_i32_28 = arith.constant 0 : i32
    %57 = arith.cmpi eq, %c2_i32_27, %c0_i32_28 : i32
    %c1_i32_29 = arith.constant 1 : i32
    %58 = arith.select %57, %c1_i32_29, %c2_i32_27 : i32
    %59 = vector.broadcast %58 : i32 to vector<4x1xi32>
    %60 = arith.remsi %45, %59 : vector<4x1xi32>
    %c0_i32_30 = arith.constant 0 : i32
    %61 = vector.broadcast %c0_i32_30 : i32 to vector<4x1xi32>
    %62 = arith.cmpi ne, %60, %61 : vector<4x1xi32>
    %c0_i32_31 = arith.constant 0 : i32
    %63 = vector.broadcast %c0_i32_31 : i32 to vector<4x1xi32>
    %64 = arith.cmpi slt, %60, %63 : vector<4x1xi32>
    %c0_i32_32 = arith.constant 0 : i32
    %65 = arith.cmpi slt, %58, %c0_i32_32 : i32
    %66 = vector.broadcast %65 : i1 to vector<4x1xi1>
    %67 = vector.broadcast %66 : vector<4x1xi1> to vector<4x1xi1>
    %68 = arith.xori %64, %67 : vector<4x1xi1>
    %69 = arith.andi %68, %62 : vector<4x1xi1>
    %70 = vector.broadcast %58 : i32 to vector<4x1xi32>
    %71 = arith.addi %60, %70 : vector<4x1xi32>
    %72 = arith.select %69, %71, %60 : vector<4x1xi1>, vector<4x1xi32>
    %c0_i32_33 = arith.constant 0 : i32
    %73 = vector.broadcast %c0_i32_33 : i32 to vector<4x1xi32>
    %74 = arith.cmpi eq, %72, %73 : vector<4x1xi32>
    %cst_34 = arith.constant 1.000000e+00 : f32
    %75 = arith.subf %56, %cst_34 : f32
    %cst_35 = arith.constant 1.000000e+00 : f32
    %76 = arith.subf %53, %cst_35 : f32
    %77 = vector.broadcast %75 : f32 to vector<4x1xf32>
    %78 = vector.broadcast %76 : f32 to vector<4x1xf32>
    %79 = arith.select %74, %77, %78 : vector<4x1xi1>, vector<4x1xf32>
    %80 = vector.broadcast %50 : vector<4x1xf32> to vector<4x128xf32>
    %81 = arith.mulf %80, %43 : vector<4x128xf32>
    %82 = arith.addf %44, %81 : vector<4x128xf32>
    %cst_36 = arith.constant 0.000000e+00 : f32
    %83 = vector.broadcast %cst_36 : f32 to vector<4x128xf32>
    %84 = arith.maximumf %83, %82 : vector<4x128xf32>
    %85 = vector.broadcast %79 : vector<4x1xf32> to vector<4x128xf32>
    %86 = arith.minimumf %85, %84 : vector<4x128xf32>
    %c0_37 = arith.constant 0 : index
    %c0_38 = arith.constant 0 : index
    %c0_39 = arith.constant 0 : index
    %87 = vector.load %arg8[%c0_37, %c0_38, %c0_39] : memref<1x4x128xf32, #tpu.memory_space<vmem>>, vector<1x4x128xf32>
    %88 = vector.shape_cast %87 : vector<1x4x128xf32> to vector<4x128xf32>
    %89 = vector.shape_cast %86 : vector<4x128xf32> to vector<1x4x128xf32>
    tpu.vector_store %arg8[%c0_37, %c0_38, %c0_39], %89 {strides = array<i32>} : memref<1x4x128xf32, #tpu.memory_space<vmem>>, vector<1x4x128xf32>,
    %90 = vector.extract_strided_slice %86 {offsets = [2, 0], sizes = [2, 128], strides = [1, 1]} : vector<4x128xf32> to vector<2x128xf32>
    %91 = vector.extract_strided_slice %86 {offsets = [0, 0], sizes = [2, 128], strides = [1, 1]} : vector<4x128xf32> to vector<2x128xf32>
    %92 = arith.subf %90, %91 : vector<2x128xf32>
    %cst_40 = arith.constant 1.000000e+00 : f32
    %93 = vector.broadcast %cst_40 : f32 to vector<2x128xf32>
    %94 = arith.addf %92, %93 : vector<2x128xf32>
    %95 = vector.extract_strided_slice %94 {offsets = [0, 0], sizes = [1, 128], strides = [1, 1]} : vector<2x128xf32> to vector<1x128xf32>
    %cst_41 = arith.constant 0.000000e+00 : f32
    %96 = vector.broadcast %cst_41 : f32 to vector<1x128xf32>
    %97 = arith.cmpf oge, %95, %96 : vector<1x128xf32>
    %98 = vector.extract_strided_slice %94 {offsets = [1, 0], sizes = [1, 128], strides = [1, 1]} : vector<2x128xf32> to vector<1x128xf32>
    %cst_42 = arith.constant 0.000000e+00 : f32
    %99 = vector.broadcast %cst_42 : f32 to vector<1x128xf32>
    %100 = arith.cmpf oge, %98, %99 : vector<1x128xf32>
    %101 = arith.andi %97, %100 : vector<1x128xi1>
    %102 = arith.extui %101 : vector<1x128xi1> to vector<1x128xi8>
    %c0_43 = arith.constant 0 : index
    %c0_44 = arith.constant 0 : index
    %c0_45 = arith.constant 0 : index
    %103 = vector.load %arg10[%c0_43, %c0_44, %c0_45] : memref<1x1x128xi8, #tpu.memory_space<vmem>>, vector<1x1x128xi8>
    %104 = vector.shape_cast %103 : vector<1x1x128xi8> to vector<1x128xi8>
    %105 = vector.shape_cast %102 : vector<1x128xi8> to vector<1x1x128xi8>
    tpu.vector_store %arg10[%c0_43, %c0_44, %c0_45], %105 {strides = array<i32>} : memref<1x1x128xi8, #tpu.memory_space<vmem>>, vector<1x1x128xi8>,
    return
  }
  func.func @transform_0(%arg0: i32, %arg1: i32, %arg2: memref<2x2xi32, #tpu.memory_space<smem>>) -> (i32, i32) {
    %c0_i32 = arith.constant 0 : i32
    %c0_i32_0 = arith.constant 0 : i32
    return %c0_i32, %arg1 : i32, i32
  }
  func.func @transform_1(%arg0: i32, %arg1: i32, %arg2: memref<2x2xi32, #tpu.memory_space<smem>>) -> (i32, i32, i32) {
    %c0_i32 = arith.constant 0 : i32
    %c0_i32_0 = arith.constant 0 : i32
    return %arg0, %c0_i32, %arg1 : i32, i32, i32
  }
  func.func @transform_2(%arg0: i32, %arg1: i32, %arg2: memref<2x2xi32, #tpu.memory_space<smem>>) -> (i32, i32, i32) {
    %c0_i32 = arith.constant 0 : i32
    %c0_i32_0 = arith.constant 0 : i32
    return %arg0, %c0_i32, %arg1 : i32, i32, i32
  }
  func.func @transform_3(%arg0: i32, %arg1: i32, %arg2: memref<2x2xi32, #tpu.memory_space<smem>>) -> (i32, i32, i32) {
    %c0_i32 = arith.constant 0 : i32
    %c0_i32_0 = arith.constant 0 : i32
    return %arg0, %c0_i32, %arg1 : i32, i32, i32
  }
  func.func @transform_4(%arg0: i32, %arg1: i32, %arg2: memref<2x2xi32, #tpu.memory_space<smem>>) -> (i32, i32, i32) {
    %c0_i32 = arith.constant 0 : i32
    %c0_i32_0 = arith.constant 0 : i32
    return %arg0, %c0_i32, %arg1 : i32, i32, i32
  }
  func.func @transform_5(%arg0: i32, %arg1: i32, %arg2: memref<2x2xi32, #tpu.memory_space<smem>>) -> (i32, i32, i32) {
    %c0_i32 = arith.constant 0 : i32
    %c0_i32_0 = arith.constant 0 : i32
    return %arg0, %c0_i32, %arg1 : i32, i32, i32
  }
  func.func @transform_6(%arg0: i32, %arg1: i32, %arg2: memref<2x2xi32, #tpu.memory_space<smem>>) -> (i32, i32, i32) {
    %c0_i32 = arith.constant 0 : i32
    %c0_i32_0 = arith.constant 0 : i32
    return %arg0, %c0_i32, %arg1 : i32, i32, i32
  }
  func.func @transform_7(%arg0: i32, %arg1: i32, %arg2: memref<2x2xi32, #tpu.memory_space<smem>>) -> (i32, i32, i32) {
    %c0_i32 = arith.constant 0 : i32
    %c0_i32_0 = arith.constant 0 : i32
    return %arg0, %c0_i32, %arg1 : i32, i32, i32
  }
  func.func @transform_8(%arg0: i32, %arg1: i32, %arg2: memref<2x2xi32, #tpu.memory_space<smem>>) -> (i32, i32, i32, i32) {
    %c0_i32 = arith.constant 0 : i32
    %c0_i32_0 = arith.constant 0 : i32
    %c0_i32_1 = arith.constant 0 : i32
    return %arg0, %arg1, %c0_i32, %c0_i32_0 : i32, i32, i32, i32
  }
}

</mosaic_0001>

<bundles_post_ra>
// kernel: tpu_custom_call.1
= control target key start
LH: loop header
LB: loop body
LE: loop exit
PB: predicated region body
PF: predicated region fallthrough
CT: control target
= control target key end

     0   :  { %s2045_s0 = inlined_call_operand.hbm [shape: s32[2,2], index: 0, kind: input, shape index: {}]   ;;  %s2046_s1 = inlined_call_operand.hbm [shape: f32[4,256], index: 1, kind: input, shape index: {}]   ;;  %s2047_s2 = inlined_call_operand.hbm [shape: f32[2,4,256], index: 2, kind: input, shape index: {}]   ;;  %s2048_s3 = inlined_call_operand.hbm [shape: f32[2,4,256], index: 3, kind: input, shape index: {}]   ;;  %s2049_s4 = inlined_call_operand.vmem [shape: f32[2,1,256], index: 4, kind: input, shape index: {}]   ;;  %s2050_s5 = inlined_call_operand.hbm [shape: f32[2,4,256], index: 5, kind: output, shape index: {0}]   ;;  %s2051_s6 = inlined_call_operand.hbm [shape: f32[2,4,256], index: 6, kind: output, shape index: {1}]   ;;  %s2052_s7 = inlined_call_operand.hbm [shape: s8[2,4,256], index: 7, kind: output, shape index: {2}]   ;;  %s2053_s8 = inlined_call_operand.vmem [shape: s8[2,1,256], index: 8, kind: output, shape index: {3}]   ;;  %s2054_s9 = inlined_call_operand.hbm [shape: s32[2,2,1,128], index: 9, kind: output, shape index: {4}]  }
   0x1   :  { %2075 = sst [smem:[#allocation30_spill]] %s2047_s2  ;;  %s1159_s11 = scalar_lea.hbm %s2045_s0, 32 }
   0x2   :  { %2076 = sst [smem:[#allocation31_spill]] %s2049_s4  ;;  %p1160_p0 = scmp.ne.s32.totalorder %s2045_s0, %s1159_s11 }
   0x3   :  { %2077 = sst [smem:[#allocation32_spill]] %s2050_s5  ;;  %p1163_p1 = scmp.lt.u32.totalorder %s1159_s11, %s2045_s0 }
   0x4   :  { %2078 = sst [smem:[#allocation33_spill]] %s2051_s6 }
   0x5   :  { %2079 = sst [smem:[#allocation34_spill]] %s2052_s7  ;;  %p1165_p2 = pnand %p1163_p1, %p1160_p0 }
   0x6   :  { %2080 = sst [smem:[#allocation35_spill]] %s2053_s8 }
   0x7   :  { %2081 = sst [smem:[#allocation36_spill]] %s2054_s9 }
   0x8   :  { %1168 = shalt.err (!%p1165_p2)  }
   0x9   :  { %s1481_s16 = smov [#allocation3]  }
   0xa   :  { %16 = dma.hbm_to_smem %s2045_s0, 32, %s1481_s16, [#allocation2] }
   0xb   :  { %1415 = dma.done.wait [#allocation2], 32 }
   0xc   :  { %1416 = vsyncadd [#allocation2], 4294967264 }
   0xd   :  { %18 = sfence }
   0xe   :  { %19 = vsyncpa [#allocation5], 0 }
   0xf   :  { %21 = vsyncpa [#allocation5 + $0x1], 0 }
  0x10   :  { %22 = vsyncpa [#allocation8], 0 }
  0x11   :  { %24 = vsyncpa [#allocation8 + $0x1], 0 }
  0x12   :  { %25 = vsyncpa [#allocation6], 0 }
  0x13   :  { %27 = vsyncpa [#allocation6 + $0x1], 0 }
  0x14   :  { %28 = vsyncpa [#allocation12], 0 }
  0x15   :  { %30 = vsyncpa [#allocation12 + $0x1], 0 }
  0x16   :  { %31 = vsyncpa [#allocation15], 0 }
  0x17   :  { %33 = vsyncpa [#allocation15 + $0x1], 0  ;;  %s1553_s19 = smov 0   ;;  %s1555_s20 = smov 0  }
  0x18   :  { %s1557_s21 = smov 0   ;;  %s1559_s0 = smov 0  }
  0x19   :  { %s1561_s22 = smov 0   ;;  %s1563_s23 = smov 0  }
  0x1a   :  { %s1565_s24 = smov 0   ;;  %s1567_s25 = smov 0  }
  0x1b   :  { %s1569_s26 = smov 0   ;;  %s1571_s27 = smov 0  }
  0x1c   :  { %s1573_s28 = smov 0  }
  0x1d LB: > { %2082 = sst [smem:[#allocation22_spill]] %s1439_s19  ;;  %s1609_s29 = sadd.s32 4294967295, %s1479_s28   ;;  %s1479_s28 = sphi %s1573_s28, %s39_s28   ;;  %s1475_s27 = sphi %s1571_s27, %s2128_s27   ;;  %s1471_s26 = sphi %s1569_s26, %s2127_s26   ;;  %s1467_s25 = sphi %s1567_s25, %s2126_s25   ;;  %s1463_s24 = sphi %s1565_s24, %s2125_s24   ;;  %s1459_s23 = sphi %s1563_s23, %s2124_s23   ;;  %s1455_s22 = sphi %s1561_s22, %s2133_s22   ;;  %s1451_s0 = sphi %s1559_s0, %s2132_s0   ;;  %s1447_s21 = sphi %s1557_s21, %s2131_s21   ;;  %s1443_s20 = sphi %s1555_s20, %s2130_s20   ;;  %s1439_s19 = sphi %s1553_s19, %s2129_s19  }
  0x1e   : > { %2083 = sst [smem:[#allocation23_spill]] %s1459_s23  ;;  %s2060_s30 = sadd.s32 4294967294, %s1479_s28  }
  0x1f   : > { %2084 = sst [smem:[#allocation24_spill]] %s1471_s26  ;;  %s48_s10 = sadd.s32 1, %s1471_s26 }
  0x20   : > { %2085 = sst [smem:[#allocation25_spill]] %s1475_s27  ;;  %s51_s11 = sadd.s32 1, %s1475_s27 }
  0x21   : > { %p49_p3 = scmp.ge.s32.totalorder %s48_s10, 2  ;;  %p2068_p4 = scmp.eq.s32.totalorder %s1479_s28, 0 }
  0x22   : > { %p2067_p5 = scmp.eq.s32.totalorder %s1609_s29, 0  ;;  %s86_s12 = sadd.s32 1, %s1447_s21 }
  0x23   : > { %s2135_s10 = smov (%p49_p3, %s48_s10), 0  ;;  %s2137_s11 = smov (!%p49_p3, %s51_s11), %s1475_s27 }
  0x24   : > { %2086 = sst [smem:[#allocation26_spill]] %s2135_s10  ;;  %s1622_s13 = ssub.s32 %s1471_s26, %s2135_s10 }
  0x25   : > { %p93_p6 = scmp.ne.s32.totalorder %s1447_s21, %s1443_s20  ;;  %p53_p7 = scmp.ge.s32.totalorder %s2137_s11, 2 }
  0x26   : > { %p99_p10 = scmp.ne.s32.totalorder %s1443_s20, %s1439_s19  ;;  %p181_p12 = scmp.eq.s32.totalorder %s1609_s29, 3 }
  0x27   : > { %p1629_p9 = por %p93_p6, %p2068_p4  ;;  %s2139_s11 = smov (%p53_p7, %s2137_s11), 0 }
  0x28   : > { %2088 = sst [smem:[#allocation27_spill]] %s2139_s11  ;;  %p1639_p11 = por %p99_p10, %p2067_p5 }
  0x29   : > { %s81_s16 = ssub.s32 %s1475_s27, %s2139_s11  ;;  %p187_p13 = scmp.eq.s32.totalorder %s2060_s30, 3 }
  0x2a   : > { %s2089_s15 = scalar_select %p1639_p11, 1, 0 }
  0x2b   : > { %s83_s17 = sor.u32 %s81_s16, %s1622_s13  ;;  %p1649_p0 = por %p181_p12, %p93_p6 }
  0x2c   : > { %p84_p1 = scmp.eq.s32.totalorder %s83_s17, 0  ;;  %p1653_p2 = por %p187_p13, %p99_p10 }
  0x2d   : > { %s2090_s18 = scalar_select %p1649_p0, 1, 0 }
  0x2e   : > { %s2092_s10 = scalar_select %p1653_p2, 1, 0 }
  0x2f   : > { %2091 = sst [smem:[#allocation28_spill]] %s2090_s18  ;;  %p2066_p3 = scmp.lt.s32.totalorder %s1479_s28, 4 }
  0x30   : > { %s1659_s19 = scalar_select %p84_p1, %s1447_s21, %s86_s12  }
  0x31   : > { %s337_s9 = sand.u32 1, %s1479_s28   ;;  %s339_s11 = sand.u32 1, %s1447_s21  }
  0x32   : > { %s1663_s7 = sshll.u32 %s339_s11, 2  ;;  %s986_s16 = sshll.u32 %s1475_s27, 1 }
  0x33   : > { %s346_s30 = sadd.s32 %s1471_s26, %s986_s16  ;;  %s341_s5 = scalar_lea.vmem [#allocation7], %s1663_s7 }
  0x34   : > { %s350_s6 = sshll.u32 %s341_s5, 4  ;;  %s987_s8 = sshll.u32 %s346_s30, 6  ;;  %s1668_s6 = int_to_ptr.vmem [resolvable:$true] %s350_s6 }
  0x35   : > { %s2093_s2 = sld [smem:[#allocation30_spill]]  ;;  %p1679_p6 = pnand %p2066_p3, %p1629_p9 }
  0x36   : > { %s1686_s30 = scalar_lea.hbm %s2048_s3, %s987_s8  ;;  %s1689_s18 = scalar_lea.sflag [#allocation8], %s337_s9 }
  0x37   : > { %p2072_p12 = pneg %p1679_p6 }
  0x3b   : > { %s1673_s4 = scalar_lea.hbm %s2093_s2, %s987_s8  ;;  %s1174_s27 = scalar_lea.hbm %s2093_s2, 256 }
  0x3c   : > { %s1169_s14 = scalar_lea.hbm %s1673_s4, 64  ;;  %p1175_p1 = scmp.lt.u32.totalorder %s1673_s4, %s2093_s2 }
  0x3d   : > { %p1170_p10 = scmp.ne.s32.totalorder %s1673_s4, %s1169_s14  ;;  %p1176_p3 = scmp.lt.u32.totalorder %s1174_s27, %s1169_s14 }
  0x3e   : > { %p1178_p4 = scmp.lt.u32.totalorder %s1169_s14, %s1673_s4 }
  0x3f   : > { %p1172_p9 = pnand %p2072_p12, %p1170_p10  ;;  %p1177_p5 = por %p1176_p3, %p1175_p1 }
  0x41   : > { %p1173_p13 = pneg %p1172_p9  ;;  %p1179_p8 = por %p1178_p4, %p1177_p5 }
  0x43   : > { %p1180_p7 = pnand %p1179_p8, %p1173_p13 }
  0x45   : > { %1183 = shalt.err (!%p1180_p7)
}
  0x46   : > { %s1184_s8 = scalar_lea.vmem %s1668_s6, 64  ;;  %s1482_s9 = smov [#allocation7]  }
  0x47   : > { %p1185_p10 = scmp.ne.s32.totalorder %s1668_s6, %s1184_s8  ;;  %s1189_s16 = sshll.u32 %s1482_s9, 4  ;;  %s1190_s16 = int_to_ptr.vmem [resolvable:$false] %s1189_s16 }
  0x48   : > { %s1191_s17 = scalar_lea.vmem %s1190_s16, 128  ;;  %p1192_p0 = scmp.lt.s32.totalorder %s1668_s6, %s1190_s16 }
  0x49   : > { %p1187_p9 = pnand %p1185_p10, %p2072_p12  ;;  %p1193_p3 = scmp.lt.s32.totalorder %s1191_s17, %s1184_s8 }
  0x4b   : > { %p1188_p2 = pneg %p1187_p9  ;;  %p1194_p1 = por %p1193_p3, %p1192_p0 }
  0x4d   : > { %p1195_p4 = pnand %p1194_p1, %p1188_p2 }
  0x4f   : > { %1198 = shalt.err (!%p1195_p4)
}
  0x50   : > { %1039 = dma.hbm_to_vmem [thread:$0]  (!%p1679_p6), %s1673_s4, 64, %s1668_s6, %s1689_s18  }
  0x51   : > { %p385_p5 = scmp.lt.s32.totalorder %s1479_s28, 5  ;;  %p2095_p8 = scmp.ge.s32.totalorder %s1479_s28, 1 }
  0x52   : > { %s58_s14 = sadd.s32 1, %s1459_s23  ;;  %p65_p2 = scmp.ne.s32.totalorder %s1459_s23, %s1455_s22 }
  0x53   : > { %p1720_p0 = pnand %p2095_p8, %p385_p5  ;;  %p2097_p7 = scmp.eq.s32.totalorder %s1622_s13, 0 }
  0x54   : > { %p2099_p13 = scmp.eq.s32.totalorder %s1479_s28, 0  ;;  %p71_p9 = scmp.ne.s32.totalorder %s1455_s22, %s1451_s0 }
  0x55   : > { %s2096_s27 = scalar_select %p1720_p0, 1, 0 }
  0x56   : > { %s1730_s12 = scalar_select %p2097_p7, %s1459_s23, %s58_s14  }
  0x57   : > { %p67_p10 = por %p2099_p13, %p65_p2  ;;  %s319_s5 = sand.u32 1, %s1459_s23  }
  0x58   : > { %2098 = sst [smem:[#allocation29_spill]] %s1730_s12  ;;  %s984_s8 = sshll.u32 %s1471_s26, 6 }
  0x59   : > { %p2100_p3 = scmp.eq.s32.totalorder %s1609_s29, 0  ;;  %s983_s6 = sshll.u32 %s319_s5, 2 }
  0x5a   : > { %s1747_s17 = scalar_lea.hbm %s2046_s1, %s984_s8  ;;  %p2102_p4 = scmp.lt.s32.totalorder %s1479_s28, 4 }
  0x5b   : > { %p1740_p1 = por %p2100_p3, %p71_p9  ;;  %s323_s0 = scalar_lea.vmem [#allocation4], %s983_s6 }
  0x5c   : > { %p1751_p5 = pnand %p2102_p4, %p67_p10  ;;  %s330_s14 = sshll.u32 %s323_s0, 4  ;;  %s1758_s14 = int_to_ptr.vmem [resolvable:$true] %s330_s14 }
  0x5d   : > { %s2101_s4 = scalar_select %p1740_p1, 1, 0 }
  0x5e   : > { %s361_s2 = scalar_lea.vmem [#allocation9], %s1663_s7  ;;  %s320_s8 = scalar_lea.sflag [#allocation5], %s319_s5 }
  0x5f   : > { %s1756_s26 = sshll.u32 %s361_s2, 4  ;;  %s1199_s9 = scalar_lea.hbm %s1747_s17, 64  ;;  %s371_s26 = int_to_ptr.vmem [resolvable:$true] %s1756_s26 }
  0x60   : > { %p1200_p8 = scmp.ne.s32.totalorder %s1747_s17, %s1199_s9  ;;  %p1201_p2 = pneg %p1751_p5 }
  0x61   : > { %s1204_s23 = scalar_lea.hbm %s2046_s1, 128  ;;  %p1205_p10 = scmp.lt.u32.totalorder %s1747_s17, %s2046_s1 }
  0x62   : > { %p1202_p7 = pnand %p1201_p2, %p1200_p8  ;;  %p1206_p9 = scmp.lt.u32.totalorder %s1204_s23, %s1199_s9 }
  0x63   : > { %p1208_p4 = scmp.lt.u32.totalorder %s1199_s9, %s1747_s17 }
  0x64   : > { %p1203_p13 = pneg %p1202_p7  ;;  %p1207_p3 = por %p1206_p9, %p1205_p10 }
  0x66   : > { %p1209_p12 = por %p1208_p4, %p1207_p3 }
  0x68   : > { %p1210_p11 = pnand %p1209_p12, %p1203_p13 }
  0x6a   : > { %1213 = shalt.err (!%p1210_p11)
}
  0x6b   : > { %s1214_s2 = scalar_lea.vmem %s1758_s14, 64  ;;  %s1483_s7 = smov [#allocation4]  }
  0x6c   : > { %p1215_p8 = scmp.ne.s32.totalorder %s1758_s14, %s1214_s2  ;;  %s1219_s12 = sshll.u32 %s1483_s7, 4  ;;  %s1220_s12 = int_to_ptr.vmem [resolvable:$false] %s1219_s12 }
  0x6d   : > { %s1221_s5 = scalar_lea.vmem %s1220_s12, 128  ;;  %p1222_p0 = scmp.lt.s32.totalorder %s1758_s14, %s1220_s12 }
  0x6e   : > { %p1217_p7 = pnand %p1215_p8, %p1201_p2  ;;  %p1223_p10 = scmp.lt.s32.totalorder %s1221_s5, %s1214_s2 }
  0x70   : > { %p1218_p1 = pneg %p1217_p7  ;;  %p1224_p9 = por %p1223_p10, %p1222_p0 }
  0x72   : > { %p1225_p3 = pnand %p1224_p9, %p1218_p1 }
  0x74   : > { %1228 = shalt.err (!%p1225_p3)
}
  0x75   : > { %1036 = dma.hbm_to_vmem [thread:$0]  (!%p1751_p5), %s1747_s17, 64, %s1758_s14, %s320_s8  }
  0x76   : > { %s1229_s23 = scalar_lea.hbm %s1686_s30, 64  ;;  %p2104_p12 = pneg %p1679_p6 }
  0x77   : > { %p1230_p11 = scmp.ne.s32.totalorder %s1686_s30, %s1229_s23  ;;  %s1234_s13 = scalar_lea.hbm %s2048_s3, 256 }
  0x78   : > { %p1235_p1 = scmp.lt.u32.totalorder %s1686_s30, %s2048_s3  ;;  %p1236_p13 = scmp.lt.u32.totalorder %s1234_s13, %s1229_s23 }
  0x79   : > { %p1232_p2 = pnand %p1230_p11, %p2104_p12  ;;  %p1238_p8 = scmp.lt.u32.totalorder %s1229_s23, %s1686_s30 }
  0x7a   : > { %p1237_p4 = por %p1236_p13, %p1235_p1 }
  0x7b   : > { %p1233_p0 = pneg %p1232_p2 }
  0x7c   : > { %p1239_p7 = por %p1238_p8, %p1237_p4 }
  0x7e   : > { %p1240_p5 = pnand %p1239_p7, %p1233_p0 }
  0x80   : > { %1243 = shalt.err (!%p1240_p5)
}
  0x81   : > { %s1244_s17 = scalar_lea.vmem %s371_s26, 64  ;;  %p2105_p9 = pmov %p2104_p12 }
  0x82   : > { %p1245_p10 = scmp.ne.s32.totalorder %s371_s26, %s1244_s17  ;;  %s1484_s14 = smov [#allocation9]  }
  0x83   : > { %s1249_s8 = sshll.u32 %s1484_s14, 4  ;;  %s1250_s8 = int_to_ptr.vmem [resolvable:$false] %s1249_s8 }
  0x84   : > { %p1247_p3 = pnand %p1245_p10, %p2105_p9  ;;  %s1251_s2 = scalar_lea.vmem %s1250_s8, 128 }
  0x85   : > { %p1252_p12 = scmp.lt.s32.totalorder %s371_s26, %s1250_s8  ;;  %p1253_p2 = scmp.lt.s32.totalorder %s1251_s2, %s1244_s17 }
  0x86   : > { %p1248_p11 = pneg %p1247_p3 }
  0x87   : > { %p1254_p1 = por %p1253_p2, %p1252_p12 }
  0x89   : > { %p1255_p13 = pnand %p1254_p1, %p1248_p11 }
  0x8b   : > { %1258 = shalt.err (!%p1255_p13)
}
  0x8c   : > { %1042 = dma.hbm_to_vmem [thread:$0]  (!%p1679_p6), %s1686_s30, 64, %s371_s26, %s1689_s18  }
  0x8d   : > { %p2106_p0 = scmp.ne.s32.totalorder %s2096_s27, 0 }
  0x8e   : > { %s391_s7 = sand.u32 (!%p2106_p0), 1, %s1455_s22   ;;  %p2107_p4 = scmp.ne.s32.totalorder (!%p2106_p0), %s2101_s4, 0 }
  0x8f   : > { %389 = sbr.rel (%p2106_p0) target bundleno = 418 (0x1a2), region = 36  ;;  %s1809_s12 = sshll.u32 (!%p2106_p0), %s391_s7, 2 }
  0x90   : > { %s392_s5 = scalar_lea.sflag (!%p2106_p0), [#allocation5], %s391_s7  ;;  %s395_s23 = scalar_lea.vmem (!%p2106_p0), [#allocation4], %s1809_s12 }
  0x96   : > { %1418 = dma.done.wait (%p2107_p4), %s392_s5, 64  }
  0x97   : > { %1420 = vsyncadd (%p2107_p4), %s392_s5, 4294967232  ;;  %s400_s26 = sand.u32 1, %s1609_s29   ;;  %s1818_s11 = sand.u32 1, %s1443_s20  }
  0x98   : > { %s1821_s30 = sshll.u32 %s1818_s11, 2  ;;  %s401_s18 = scalar_lea.sflag [#allocation8], %s400_s26 }
  0x99   : > { %s404_s27 = scalar_lea.vmem [#allocation7], %s1821_s30  ;;  %p2108_p6 = scmp.ne.s32.totalorder %s2089_s15, 0 }
  0x9b   : > { %1422 = dma.done.wait (%p2108_p6), %s401_s18, 128  }
  0x9c   : > { %1424 = vsyncadd (%p2108_p6), %s401_s18, 4294967168  ;;  %v499_v0 = vld [vmem:[%s404_s27] sm:$0xf]  ;;  %s1001_s4 = sshll.u32 %s1463_s24, 7  ;;  %v522_v4 = vlaneseq  ;;  %vm528_vm2 = vcmask 1043456   ;;  %v1485_v8 = vmov 0  }
  0x9d   : > { %v999_v1 = vmul.f32 -1.442695, %v499_v0  ;;  %s519_s9 = ssub.s32 256, %s1001_s4  ;;  %p483_p7 = scmp.lt.s32.totalorder %s1467_s25, 1  ;;  %v1486_v21 = vmov 1.0   ;;  %vm622_vm13 = vcmask 1040384  }
  0x9e   : > { %p520_p8 = scmp.lt.s32.totalorder %s519_s9, 128  ;;  %v523_v5 = vand.u32 127, %v522_v4  ;;  %p485_p5 = scmp.lt.s32.totalorder %s1463_s24, 1  ;;  %v553_v18 = vshrl.u32 %v522_v4, 7  ;;  %v567_v24 = vld [vmem:[%s395_s23] sm:$0xf] }
  0x9f   : > { %1149 = vpow2.f32 %v999_v1  ;;  %s484_s15 = scalar_select %p483_p7, %s1467_s25, 1  ;;  %vm623_vm14 = vsmask.f32 0 }
  0xa0   : > { %s2141_s9 = smov (!%p520_p8, %s519_s9), 128  ;;  %s2109_s14 = sld [smem:[#allocation31_spill]]  ;;  %vm570_vm4 = vcmp.lt.s32.totalorder %v553_v18, 2  ;;  %v582_v25 = vand.u32 1, %v553_v18  ;;  %v554_v30 = vsub.s32 0, %v553_v18 }
  0xa1   : > { %v524_v6 = vstv %s2141_s9  ;;  %s486_s16 = scalar_select %p485_p5, %s1463_s24, 1  ;;  %v571_v22 = vsel %vm570_vm4, -1.0, %v1486_v21 }
  0xa2   : > { %vm525_vm0 = vcmp.lt.s32.totalorder %v523_v5, %v524_v6  ;;  %s997_s13 = sshll.u32 %s484_s15, 1  ;;  %s1002_s2 = sshll.u32 %s1467_s25, 7  ;;  %vm590_vm5 = vcmp.eq.s32.totalorder %v582_v25, 0 }
  0xa3   : > { %s1841_s6 = sadd.s32 %s997_s13, %s486_s16  ;;  %s575_s7 = sadd.s32 1, %s1002_s2 }
  0xa4   : > { %s573_s5 = sld [smem:[#allocation3 + %s1002_s2]]  ;;  %s413_s27 = scalar_lea.vmem [#allocation9], %s1821_s30 }
  0xa5   : > { %s576_s18 = sld [smem:[#allocation3 + %s575_s7]]  ;;  %v566_v20 = vld [vmem:[%s413_s27] sm:$0xf]  ;;  %s1007_s12 = sshll.u32 %s1467_s25, 1 }
  0xa6   : > { %s489_s8 = scalar_lea.vmem %s2109_s14, %s1841_s6  ;;  %v596_v23 = vmul.f32 %v571_v22, %v566_v20  ;;  %s1863_s23 = sadd.s32 %s1463_s24, %s1007_s12 }
  0xa7   : > { %v506_v15 = vld [vmem:[%s489_s8] sm:$0x1]  ;;  %s2112_s17 = sld [smem:[#allocation35_spill]]  ;;  %s461_s25 = scalar_lea.vmem [#allocation11], %s1821_s30 }
  0xa8   : > { %v1000_v16 = vmul.f32 -1.442695, %v506_v15  ;;  %v597_v26 = vadd.f32 %v596_v23, %v567_v24  ;;  %s1008_s8 = sshll.u32 %s1863_s23, 6  ;;  %s2113_s24 = sld [smem:[#allocation28_spill]] }
  0xa9   : > { %v1150_v2 = vpop.eup %1149  ;;  %s2114_s7 = sld [smem:[#allocation33_spill]]  ;;  %s1012_s27 = sshll.u32 %s1863_s23, 4 }
  0xaa   : > { %v503_v3 = vadd.f32 1.0, %v1150_v2  ;;  %s574_s4 = scvt.s32.f32 %s573_s5  ;;  %v598_v28 = vmax.f32 %v597_v26, 0.0 }
  0xab   : > { %s577_s9 = scvt.s32.f32 %s576_s18  ;;  %s679_s18 = sshll.u32 %s461_s25, 4  ;;  %s1883_s18 = int_to_ptr.vmem [resolvable:$true] %s679_s18 }
  0xac   : > { %1151 = vrcp.f32 %v503_v3  ;;  %s1004_s16 = sadd.f32 -1.0, %s574_s4  ;;  %s1888_s4 = scalar_lea.sflag [#allocation12], %s400_s26 }
  0xad   : > { %1153 = vpow2.f32 %v1000_v16  ;;  %s1003_s15 = sadd.f32 -1.0, %s577_s9  ;;  %s496_s14 = scalar_lea.vmem %s2112_s17, %s1841_s6 }
  0xae   : > { %v594_v29 = vstv %s1004_s16  ;;  %v625_v51 = vld [vmem:[%s496_s14] sm:$0x1]  ;;  %s1259_s9 = scalar_lea.vmem %s1883_s18, 64  ;;  %p2115_p9 = scmp.ne.s32.totalorder %s2113_s24, 0 }
  0xaf   : > { %v593_v27 = vstv %s1003_s15  ;;  %s1880_s5 = scalar_lea.hbm %s2114_s7, %s1008_s8  ;;  %p1260_p10 = scmp.ne.s32.totalorder %s1883_s18, %s1259_s9 }
  0xb0   : > { %v595_v31 = vsel %vm590_vm5, %v593_v27, %v594_v29  ;;  %s1487_s15 = smov [#allocation11]  }
  0xb1   : > { %v599_v33 = vmin.f32 %v595_v31, %v598_v28  ;;  %p1261_p3 = pnand %p1260_p10, %p2115_p9  ;;  %s1263_s16 = sshll.u32 %s1487_s15, 4  ;;  %s1264_s16 = int_to_ptr.vmem [resolvable:$false] %s1263_s16 }
  0xb2   : > { %s1265_s12 = scalar_lea.vmem %s1264_s16, 128  ;;  %p1266_p12 = scmp.lt.s32.totalorder %s1883_s18, %s1264_s16 }
  0xb3   : > { %v602_v34 = vrot.slane %v599_v33, 6  ;;  %600 = vst [vmem:[%s461_s25] sm:$0xf] %v599_v33  ;;  %p1262_p11 = pneg %p1261_p3  ;;  %p1267_p2 = scmp.lt.s32.totalorder %s1265_s12, %s1259_s9 }
  0xb5   : > { %v604_v36 = vsub.f32 %v599_v33, %v602_v34  ;;  %p1268_p1 = por %p1267_p2, %p1266_p12 }
  0xb6   : > { %v1831_v7 = vpop.eup %1151 }
  0xb7   : > { %vm513_vm1 = vcmp.gt.f32.partialorder %v1831_v7, 0.3  ;;  %v1154_v17 = vpop.eup %1153  ;;  %v605_v37 = vadd.f32 1.0, %v604_v36  ;;  %p1269_p13 = pnand %p1268_p1, %p1262_p11 }
  0xb8   : > { %vm526_vm3 = vmand %vm513_vm1, %vm525_vm0  ;;  %v510_v19 = vadd.f32 1.0, %v1154_v17 }
  0xb9   : > { %v527_v9 = vsel %vm526_vm3, 1, %v1485_v8  ;;  %vm606_vm6 = vcmp.ge.f32.partialorder %v605_v37, 0.0  ;;  %vm1858_vm11 = vmpackc.low %vm513_vm1, %vm513_vm1 }
  0xba   : > { %v529_v10 = vsel %vm528_vm2, %v527_v9, 0  ;;  %1155 = vrcp.f32 %v510_v19  ;;  %v607_v39 = vsel %vm606_vm6, 1, %v1485_v8  ;;  %vm624_vm1 = vmand %vm622_vm13, %vm623_vm14 }
  0xbb   : > { %v531_v11 = vshrl.u32 %v529_v10, 16  ;;  %v530_v12 = vand.u32 65535, %v529_v10  ;;  %v608_v40 = vrot.slane %v607_v39, 1  ;;  %vm515_vm2 = vmpackc.even %vm1858_vm11, %vm1858_vm11 }
  0xbc   : > { %v516_v55 = vsel %vm515_vm2, 16843009, %v1485_v8 }
  0xbd   : > { %v533_v13 = vcvt.s32.f32 %v531_v11  ;;  %v532_v14 = vcvt.s32.f32 %v530_v12  ;;  %vm609_vm7 = vcmp.ne.s32.totalorder %v608_v40, 0 }
  0xbe   : > { %vm610_vm8 = vmand %vm606_vm6, %vm609_vm7 }
  0xbf   : > { %536 = vadd.xlane.f32.xlu0 %v533_v13  ;;  %vm611_vm9 = vmpackc.low %vm610_vm8, %vm610_vm8 }
  0xc0   : > { %vm612_vm10 = vmpackc.even %vm611_vm9, %vm611_vm9 }
  0xc1   : > { %v613_v41 = vsel %vm612_vm10, 16843009, %v1485_v8 }
  0xc2   : > { %v614_v42 = vunpack.c.0.s8 %v613_v41 }
  0xc3   : > { %534 = vadd.xlane.f32.xlu0 %v532_v14 }
  0xc4   : > { %v1156_v32 = vpop.eup %1155  ;;  %v615_v43 = vpack.c.b16 %v614_v42, %v614_v42 }
  0xc5   : > { %v555_v35 = vrot.slane %v1156_v32, %v554_v30 }
  0xc6   : > { %v616_v45 = vpack.c.b8 %v615_v43, %v615_v43 }
  0xc7   : > { %v557_v38 = vmul.f32 %v1831_v7, %v555_v35 }
  0xc8   : > { %v618_v48 = vshrl.u32 %v616_v45, 16 }
  0xc9   : > { %1157 = vrsqrt.f32 %v557_v38  ;;  %vm560_vm12 = vcmp.eq.f32.partialorder %v557_v38, inf  ;;  %v563_v49 = vand.u32 2147483648, %v557_v38  ;;  %vm562_vm15 = vcmp.eq.f32.partialorder %v557_v38, 0.0 }
  0xca   : > { %vm620_vm0 = vnez %v618_v48 }
  0xcb   : > { %v621_v52 = vsel %vm620_vm0, 16843009, %v1485_v8 }
  0xcc   : > { %v626_v54 = vsel %vm624_vm1, %v621_v52, %v625_v51 }
  0xcd   : > { %627 = vst [vmem:[%s496_s14] sm:$0x1] %v626_v54 }
  0xd3   : > { %v1158_v44 = vpop.eup %1157 }
  0xd4   : > { %v559_v46 = vmul.f32 %v1158_v44, %v557_v38 }
  0xd6   : > { %v561_v50 = vsel %vm560_vm12, %v557_v38, %v559_v46 }
  0xd7   : > { %v564_v53 = vsel %vm562_vm15, %v563_v49, %v561_v50 }
  0xd8   : > { %1272 = shalt.err (!%p1269_p13)
}
  0xd9   : > { %s1273_s29 = scalar_lea.hbm %s1880_s5, 64  ;;  %s1277_s0 = scalar_lea.hbm %s2114_s7, 256 }
  0xda   : > { %p1274_p0 = scmp.ne.s32.totalorder %s1880_s5, %s1273_s29  ;;  %p1278_p8 = scmp.lt.u32.totalorder %s1880_s5, %s2114_s7 }
  0xdb   : > { %p1279_p7 = scmp.lt.u32.totalorder %s1277_s0, %s1273_s29  ;;  %p1281_p10 = scmp.lt.u32.totalorder %s1273_s29, %s1880_s5 }
  0xdc   : > { %p1275_p4 = pnand %p1274_p0, %p2115_p9 }
  0xdd   : > { %p1280_p5 = por %p1279_p7, %p1278_p8 }
  0xde   : > { %p1276_p6 = pneg %p1275_p4 }
  0xdf   : > { %p1282_p3 = por %p1281_p10, %p1280_p5 }
  0xe1   : > { %p1283_p11 = pnand %p1282_p3, %p1276_p6 }
  0xe3   : > { %1286 = shalt.err (!%p1283_p11)
}
  0xe4   : > { %1026 = dma.vmem_to_hbm [thread:$0]  (%p2115_p9), %s1883_s18, 64, %s1880_s5, %s1888_s4  }
  0xe5   : > { %s454_s25 = scalar_lea.vmem [#allocation10], %s1821_s30  ;;  %s2116_s9 = sld [smem:[#allocation32_spill]] }
  0xe6   : > { %565 = vst [vmem:[%s454_s25] sm:$0xf] %v564_v53  ;;  %s664_s16 = sshll.u32 %s454_s25, 4  ;;  %s467_s12 = scalar_lea.vmem [#allocation13], %s1818_s11  ;;  %s1920_s16 = int_to_ptr.vmem [resolvable:$true] %s664_s16 }
  0xe7   : > { %517 = vst [vmem:[%s467_s12] sm:$0x1] %v516_v55  ;;  %s2117_s30 = sld [smem:[#allocation34_spill]]  ;;  %s629_s26 = scalar_lea.sflag [#allocation6], %s1818_s11 }
  0xe8   : > { %s1287_s13 = scalar_lea.vmem %s1920_s16, 64 }
  0xe9   : > { %p1288_p12 = scmp.ne.s32.totalorder %s1920_s16, %s1287_s13 }
  0xeb   : > { %s1918_s15 = scalar_lea.hbm %s2116_s9, %s1008_s8  ;;  %p1289_p2 = pnand %p1288_p12, %p2115_p9 }
  0xec   : > { %s1488_s8 = smov [#allocation10]  }
  0xed   : > { %s1930_s18 = scalar_lea.hbm %s2117_s30, %s1012_s27  ;;  %p1290_p1 = pneg %p1289_p2 }
  0xee   : > { %s1291_s0 = sshll.u32 %s1488_s8, 4  ;;  %s1292_s0 = int_to_ptr.vmem [resolvable:$false] %s1291_s0 }
  0xef   : > { %s1293_s17 = scalar_lea.vmem %s1292_s0, 128  ;;  %p1294_p13 = scmp.lt.s32.totalorder %s1920_s16, %s1292_s0 }
  0xf0   : > { %p1295_p0 = scmp.lt.s32.totalorder %s1293_s17, %s1287_s13 }
  0xf2   : > { %p1296_p4 = por %p1295_p0, %p1294_p13 }
  0xf4   : > { %p1297_p6 = pnand %p1296_p4, %p1290_p1 }
  0xf6   : > { %1300 = shalt.err (!%p1297_p6)
}
  0xf7   : > { %s1301_s14 = scalar_lea.hbm %s1918_s15, 64  ;;  %s1305_s2 = scalar_lea.hbm %s2116_s9, 256 }
  0xf8   : > { %p1302_p8 = scmp.ne.s32.totalorder %s1918_s15, %s1301_s14  ;;  %p1306_p10 = scmp.lt.u32.totalorder %s1918_s15, %s2116_s9 }
  0xf9   : > { %p1307_p3 = scmp.lt.u32.totalorder %s1305_s2, %s1301_s14  ;;  %p1309_p12 = scmp.lt.u32.totalorder %s1301_s14, %s1918_s15 }
  0xfa   : > { %p1303_p7 = pnand %p1302_p8, %p2115_p9 }
  0xfb   : > { %p1308_p11 = por %p1307_p3, %p1306_p10 }
  0xfc   : > { %p1304_p5 = pneg %p1303_p7 }
  0xfd   : > { %p1310_p2 = por %p1309_p12, %p1308_p11 }
  0xff   : > { %p1311_p1 = pnand %p1310_p2, %p1304_p5 }
 0x101   : > { %1314 = shalt.err (!%p1311_p1)
}
 0x102   : > { %1025 = dma.vmem_to_hbm [thread:$0]  (%p2115_p9), %s1920_s16, 64, %s1918_s15, %s629_s26  }
 0x103   : > { %s694_s13 = sshll.u32 %s467_s12, 4  ;;  %s1489_s0 = smov [#allocation13]   ;;  %s695_s13 = int_to_ptr.vmem [resolvable:$true] %s694_s13 }
 0x104   : > { %s1315_s8 = scalar_lea.vmem %s695_s13, 16  ;;  %s1319_s17 = sshll.u32 %s1489_s0, 4  ;;  %s1320_s17 = int_to_ptr.vmem [resolvable:$false] %s1319_s17 }
 0x105   : > { %p1316_p13 = scmp.ne.s32.totalorder %s695_s13, %s1315_s8  ;;  %s1321_s14 = scalar_lea.vmem %s1320_s17, 32 }
 0x106   : > { %p1322_p6 = scmp.lt.s32.totalorder %s695_s13, %s1320_s17  ;;  %p1323_p8 = scmp.lt.s32.totalorder %s1321_s14, %s1315_s8 }
 0x107   : > { %p1317_p0 = pnand %p1316_p13, %p2115_p9 }
 0x108   : > { %p1324_p7 = por %p1323_p8, %p1322_p6 }
 0x109   : > { %p1318_p4 = pneg %p1317_p0 }
 0x10b   : > { %p1325_p5 = pnand %p1324_p7, %p1318_p4 }
 0x10d   : > { %1328 = shalt.err (!%p1325_p5)
}
 0x10e   : > { %s1329_s15 = scalar_lea.hbm %s1930_s18, 16  ;;  %s1333_s26 = scalar_lea.hbm %s2117_s30, 64 }
 0x10f   : > { %p1330_p10 = scmp.ne.s32.totalorder %s1930_s18, %s1329_s15  ;;  %p1334_p12 = scmp.lt.u32.totalorder %s1930_s18, %s2117_s30 }
 0x110   : > { %p1335_p2 = scmp.lt.u32.totalorder %s1333_s26, %s1329_s15  ;;  %p1337_p13 = scmp.lt.u32.totalorder %s1329_s15, %s1930_s18 }
 0x111   : > { %p1331_p3 = pnand %p1330_p10, %p2115_p9 }
 0x112   : > { %p1336_p1 = por %p1335_p2, %p1334_p12 }
 0x113   : > { %p1332_p11 = pneg %p1331_p3 }
 0x114   : > { %p1338_p0 = por %p1337_p13, %p1336_p1 }
 0x116   : > { %p1339_p4 = pnand %p1338_p0, %p1332_p11 }
 0x118   : > { %1342 = shalt.err (!%p1339_p4)
}
 0x119   : > { %1027 = dma.vmem_to_hbm [thread:$0]  (%p2115_p9), %s695_s13, 16, %s1930_s18, %s1888_s4  }
 0x11a   : > { %s482_s2 = scalar_lea.vmem [#allocation14], %s1818_s11  ;;  %s2118_s13 = sld [smem:[#allocation36_spill]] }
 0x11b   : > { %s712_s29 = sshll.u32 %s482_s2, 4  ;;  %s650_s0 = scalar_lea.sflag [#allocation15], %s1818_s11  ;;  %s1975_s29 = int_to_ptr.vmem [resolvable:$true] %s712_s29 }
 0x11c   : > { %s1343_s17 = scalar_lea.vmem %s1975_s29, 16  ;;  %s1490_s14 = smov [#allocation14]  }
 0x11d   : > { %p1344_p6 = scmp.ne.s32.totalorder %s1975_s29, %s1343_s17  ;;  %s1347_s15 = sshll.u32 %s1490_s14, 4  ;;  %s1348_s15 = int_to_ptr.vmem [resolvable:$false] %s1347_s15 }
 0x11e   : > { %s1349_s16 = scalar_lea.vmem %s1348_s15, 32  ;;  %p1350_p5 = scmp.lt.s32.totalorder %s1975_s29, %s1348_s15 }
 0x11f   : > { %p1345_p8 = pnand %p1344_p6, %p2115_p9  ;;  %p1351_p10 = scmp.lt.s32.totalorder %s1349_s16, %s1343_s17 }
 0x120   : > { %s1982_s8 = scalar_lea.hbm %s2118_s13, %s1012_s27 }
 0x121   : > { %p1346_p7 = pneg %p1345_p8  ;;  %p1352_p3 = por %p1351_p10, %p1350_p5 }
 0x123   : > { %p1353_p11 = pnand %p1352_p3, %p1346_p7 }
 0x14c   : > { %v537_v56 = vpop.xlane.xlu0 %536 }
 0x14d   : > { %v539_v57 = vcvt.f32.s32 %v537_v56 }
 0x14f   : > { %v540_v59 = vshll.u32 %v539_v57, 16 }
 0x150   : > { %v535_v58 = vpop.xlane.xlu0 %534 }
 0x151   : > { %v538_v60 = vcvt.f32.s32 %v535_v58 }
 0x153   : > { %v541_v61 = vadd.s32 %v540_v59, %v538_v60 }
 0x155   : > { %v542_v62 = vrot.slane %v541_v61, 4 }
 0x157   : > { %v543_v63 = vadd.s32 %v542_v62, %v541_v61 }
 0x159   : > { %v544_v0 = vrot.slane %v543_v63, 2 }
 0x15b   : > { %v545_v1 = vadd.s32 %v544_v0, %v543_v63 }
 0x15d   : > { %v546_v2 = vrot.slane %v545_v1, 1 }
 0x15f   : > { %v547_v3 = vadd.s32 %v546_v2, %v545_v1 }
 0x161   : > { %1017 = vpush %v547_v3 }
 0x192   : > { %s1018_s4 = spop %1017 }
 0x193   : > { %v549_v4 = vstv %s1018_s4 }
 0x194   : > { %550 = vst [vmem:[%s482_s2] sm:$0x1] %v549_v4 }
 0x195   : > { %1356 = shalt.err (!%p1353_p11)
}
 0x196   : > { %s1357_s11 = scalar_lea.hbm %s1982_s8, 16  ;;  %s1361_s12 = scalar_lea.hbm %s2118_s13, 64 }
 0x197   : > { %p1358_p12 = scmp.ne.s32.totalorder %s1982_s8, %s1357_s11  ;;  %p1362_p13 = scmp.lt.u32.totalorder %s1982_s8, %s2118_s13 }
 0x198   : > { %p1363_p0 = scmp.lt.u32.totalorder %s1361_s12, %s1357_s11  ;;  %p1365_p6 = scmp.lt.u32.totalorder %s1357_s11, %s1982_s8 }
 0x199   : > { %p1359_p2 = pnand %p1358_p12, %p2115_p9 }
 0x19a   : > { %p1364_p4 = por %p1363_p0, %p1362_p13 }
 0x19b   : > { %p1360_p1 = pneg %p1359_p2 }
 0x19c   : > { %p1366_p8 = por %p1365_p6, %p1364_p4 }
 0x19e   : > { %p1367_p7 = pnand %p1366_p8, %p1360_p1 }
 0x1a0   : > { %1370 = shalt.err (!%p1367_p7)
}
 0x1a1   : > { %1028 = dma.vmem_to_hbm [thread:$0]  (%p2115_p9), %s1975_s29, 16, %s1982_s8, %s650_s0  }
 0x1a2 PF: > { %s2119_s6 = sld [smem:[#allocation22_spill]]  ;;  %p1057_p5 = scmp.ge.s32.totalorder %s1479_s28, 2 }
 0x1a3   : > { %p2120_p10 = scmp.ne.s32.totalorder %s2092_s10, 0 }
 0x1a5   : > { %p1044_p3 = pnand %p1057_p5, %p2120_p10 }
 0x1a8   : > { %s724_s2 = sand.u32 1, %s2119_s6  }
 0x1a9   : > { %s725_s4 = scalar_lea.sflag [#allocation6], %s724_s2 }
 0x1aa   : > { %1426 = dma.done.wait (!%p1044_p3), %s725_s4, 64  }
 0x1ab   : > { %1428 = vsyncadd (!%p1044_p3), %s725_s4, 4294967232  ;;  %s2121_s18 = sadd.s32 4294967294, %s1479_s28  }
 0x1ac   : > { %s733_s5 = sand.u32 1, %s2121_s18  }
 0x1ad   : > { %s734_s17 = scalar_lea.sflag [#allocation12], %s733_s5 }
 0x1ae   : > { %1430 = dma.done.wait (!%p1044_p3), %s734_s17, 80  }
 0x1af   : > { %1432 = vsyncadd (!%p1044_p3), %s734_s17, 4294967216  ;;  %s761_s24 = scalar_lea.sflag [#allocation15], %s724_s2 }
 0x1b0   : > { %1434 = dma.done.wait (!%p1044_p3), %s761_s24, 16  }
 0x1b1   : > { %1436 = vsyncadd (!%p1044_p3), %s761_s24, 4294967280  ;;  %s39_s28 = sadd.s32 1, %s1479_s28   ;;  %s2122_s29 = smov %s1659_s19 }
 0x1b2   : > { %p36_p9 = scmp.ge.s32.totalorder %s39_s28, 6   ;;  %s2123_s10 = sld [smem:[#allocation23_spill]] }
 0x1b3   : > { %s2124_s23 = sld [smem:[#allocation29_spill]]  ;;  %s2125_s24 = sld [smem:[#allocation24_spill]] }
 0x1b4   : > { %s2126_s25 = sld [smem:[#allocation25_spill]]  ;;  %s2127_s26 = sld [smem:[#allocation26_spill]] }
 0x1b5   : > { %s2128_s27 = sld [smem:[#allocation27_spill]]  ;;  %s2129_s19 = smov %s1443_s20 }
 0x1b6   : > { %s2130_s20 = smov %s1447_s21  ;;  %s2131_s21 = smov %s2122_s29 }
 0x1b7   : > { %s2132_s0 = smov %s1455_s22  ;;  %38 = sbr.rel (!%p36_p9) target bundleno = 29 (0x1d), region = 169 }
 0x1b8   : > { %s2133_s22 = smov %s2123_s10 }
 0x1be   :  { %765 = vsyncpa [#allocation5], 1 }
 0x1bf   :  { %767 = vsyncpa [#allocation5 + $0x1], 1 }
 0x1c0   :  { %768 = vsyncpa [#allocation8], 1 }
 0x1c1   :  { %770 = vsyncpa [#allocation8 + $0x1], 1 }
 0x1c2   :  { %771 = vsyncpa [#allocation6], 1 }
 0x1c3   :  { %773 = vsyncpa [#allocation6 + $0x1], 1 }
 0x1c4   :  { %774 = vsyncpa [#allocation12], 1 }
 0x1c5   :  { %776 = vsyncpa [#allocation12 + $0x1], 1 }
 0x1c6   :  { %777 = vsyncpa [#allocation15], 1 }
 0x1c7   :  { %779 = vsyncpa [#allocation15 + $0x1], 1 }

</bundles_post_ra>
